<compile_context>
chip_gen: v7x
topology: tpu7x:2x2x1
jax: 0.10.0
libtpu: 0.0.40
codegen_flags: <defaults>
</compile_context>

<pallas_src>
import functools

import numpy as np
import jax
import jax.numpy as jnp
from jax.experimental import pallas as pl
from jax.experimental.pallas import tpu as pltpu

SQRT2 = float(np.sqrt(2.0))
LAMBDA_WI = 0.5
# exp(-lambda * distance) for the (2, 3) unfold window:
#   distance_kernel_x2 = [sqrt(2), 1, sqrt(2), sqrt(2), 1, sqrt(2)]
C_EDGE = float(np.exp(-LAMBDA_WI * SQRT2))   # side taps   (kw = 0, 2)
C_MID = float(np.exp(-LAMBDA_WI * 1.0))      # centre taps (kw = 1)

# Approximate EUP reciprocal trades ~1e-3-level accuracy for throughput
# (moves work off the VPU).  Set to False for <1e-5 agreement with PyTorch.
APPROX_RECIP = True


def _recip(v):
    return pl.reciprocal(v, approx=APPROX_RECIP)


def _upsample_kernel(h_last_row, gmin_ref, x_ref, xn_ref, o_ref):
    """One (batch, H-tile) grid step.

    h_last_row: static python int, H - 1 (global index of the last input row)
    gmin_ref  : (1, 1)        f32 SMEM -- global min over the unfold windows
    x_ref     : (1, TH, Wp)   f32 VMEM -- input rows [i*TH, (i+1)*TH)
    xn_ref    : (1, 1, 1, Wp) f32 VMEM -- halo: input row (i+1)*TH (clamped to H-1)
    o_ref     : (1, TH, 2*Wp) f32 VMEM -- lanes [0,Wp): even rows, [Wp,2Wp): odd rows
    """
    th = x_ref.shape[1]
    wp = x_ref.shape[2]
    i = pl.program_id(1)
    g = gmin_ref[0, 0]

    x_tile = x_ref[0]                                    # (TH, Wp)
    halo = xn_ref[0, 0]                                  # (1, Wp)
    xall = jnp.concatenate([x_tile, halo], axis=0)       # (TH+1, Wp)

    # weight_function without the distance factor, computed ONCE per input row:
    #   2 / (1 + exp(v - gmin)) * (v != 0)
    # -> one EUP exp + one EUP reciprocal per input element, no VPU divide,
    #    and no duplicated weight work between adjacent row pairs.
    nz = (xall != 0.0).astype(jnp.float32)
    w = (2.0 * nz) * _recip(1.0 + jnp.exp(xall - g))     # (TH+1, Wp)
    xw = xall * w

    # Vertical pairing: interpolated (odd) row r combines input rows r, r+1.
    p = xw[:-1, :] + xw[1:, :]                           # sum(value * weight)
    q = w[:-1, :] + w[1:, :]                             # sum(weight)

    # Horizontal [C_EDGE, C_MID, C_EDGE] taps.  Lane shifts with zero fill
    # reproduce F.unfold's zero column padding (those taps have value 0, hence
    # weight 0).  pltpu.roll runs on the (otherwise idle) XLU slot; the iota
    # masks kill the wrapped boundary lane.
    lane = jax.lax.broadcasted_iota(jnp.int32, (th, wp), 1)
    first_lane = lane == 0
    last_lane = lane == wp - 1

    def hfilt(a):
        left = jnp.where(first_lane, 0.0, pltpu.roll(a, 1, axis=1))       # a[:, c-1]
        right = jnp.where(last_lane, 0.0, pltpu.roll(a, wp - 1, axis=1))  # a[:, c+1]
        return C_MID * a + C_EDGE * (left + right)

    num = hfilt(p)
    den = hfilt(q)
    den = jnp.where(den == 0.0, 1.0, den)
    pix = num * _recip(den)                              # (TH, Wp)

    # torch.dstack(...) semantics: the odd output row paired with the LAST
    # input row is a plain copy of that row, not an interpolation.  A global
    # row-index mask keeps the store full-tile and handles ragged last tiles.
    row = i * th + jax.lax.broadcasted_iota(jnp.int32, (th, 1), 0)
    odd = jnp.where(row == h_last_row, x_tile, pix)

    # Two full-tile, lane- and sublane-dense (unmasked) stores.
    o_ref[0, :, pl.ds(0, wp)] = x_tile                   # even output rows
    o_ref[0, :, pl.ds(wp, wp)] = odd                     # odd output rows


def _vmem_capacity_bytes():
    try:
        info = pltpu.get_tpu_info()
        cap = int(getattr(info, "vmem_capacity_bytes", 0))
        if cap > 0:
            return cap
    except Exception:
        pass
    return 64 * 1024 * 1024   # conservative default (v7x per-core VMEM)


def _round_down_mult8(v):
    return max(8, (v // 8) * 8)


def _pick_tile_h(B, H, Wp, vmem_capacity_bytes):
    """Pick the H-tile size.

    Real per-step VMEM footprint is roughly:
      input block (double buffered)            ~ 2x block
      output block (2*Wp wide, double buffered)~ 4x block
      ~6-8 live (TH, Wp) f32 temporaries       ~ 6-8x block
    i.e. ~12-14x the input block, so budget against 14x and leave the compiler
    ~40% of physical VMEM of headroom.
    """
    if H <= 8:
        return H                      # single (full-dim) tile; always legal
    budget = int(0.6 * vmem_capacity_bytes)
    max_rows = max(8, budget // (14 * 4 * Wp))
    th = _round_down_mult8(min(max_rows, H))
    # Ensure enough grid steps for pipelining and so both v7x TensorCores get
    # work (both grid axes are "parallel").
    min_steps = 4
    while th > 8 and B * pl.cdiv(H, th) < min_steps:
        th = _round_down_mult8(th // 2)
    return th


def upsampling_conv_forward(x, tile_h=None):
    """JAX/Pallas equivalent of Upsampling_Conv.forward (upsampling_factor=2).

    x: (B, 1, H, W) float32  ->  (B, 1, 2H, W) float32
    """
    B, C, H, W = x.shape
    assert C == 1, "module semantics (broadcast into result) require n_channels == 1"
    assert H >= 2
    xs = x[:, 0].astype(jnp.float32)                     # (B, H, W)

    # Lane-dense layout: pad W to a multiple of 128 only when needed.  Padded
    # zero columns behave exactly like F.unfold's zero padding (weight 0) and
    # are sliced off at the end, so column W-1 stays exact.
    # TODO(synk): for W % 128 != 0 the pad + final slice add one extra
    # read/write of x and of the 2x-sized output; a fully unpadded kernel
    # (block last dim == full W, masked tail lanes) would remove that traffic.
    Wp = ((W + 127) // 128) * 128
    xs_p = xs if Wp == W else jnp.pad(xs, ((0, 0), (0, 0), (0, Wp - W)))

    vmem_cap = _vmem_capacity_bytes()
    TH = int(tile_h) if tile_h is not None else _pick_tile_h(B, H, Wp, vmem_cap)
    assert TH == H or TH % 8 == 0, (H, TH)
    nH = pl.cdiv(H, TH)               # ragged last tile is handled by Pallas

    # Global min over the unfold windows == min(min(x), 0): the zero-padded
    # window columns are always part of some window.  Computed over xs_p so
    # XLA can fuse the reduction with the pad pass (still one extra HBM read).
    gmin = jnp.minimum(jnp.min(xs_p), jnp.float32(0.0)).reshape(1, 1)

    # Halo table: for H-tile i, the input row just below it ((i+1)*TH, clamped
    # to H-1).  Tiny (nH rows per batch) -> ~0 extra HBM traffic.
    nxt = np.minimum(np.arange(1, nH + 1) * TH, H - 1).astype(np.int32)
    x_next = jnp.take(xs_p, jnp.asarray(nxt), axis=1)[:, :, None, :]  # (B,nH,1,Wp)

    vmem_limit = min(vmem_cap, max(32 * 1024 * 1024, int(0.75 * vmem_cap)))

    out = pl.pallas_call(
        functools.partial(_upsample_kernel, H - 1),
        out_shape=jax.ShapeDtypeStruct((B, H, 2 * Wp), jnp.float32),
        grid=(B, nH),
        in_specs=[
            pl.BlockSpec((1, 1), lambda b, i: (0, 0),
                         memory_space=pltpu.MemorySpace.SMEM),        # gmin
            pl.BlockSpec((1, TH, Wp), lambda b, i: (b, i, 0)),        # x tile
            pl.BlockSpec((1, 1, 1, Wp), lambda b, i: (b, i, 0, 0)),   # halo row
        ],
        out_specs=pl.BlockSpec((1, TH, 2 * Wp), lambda b, i: (b, i, 0)),
        compiler_params=pltpu.CompilerParams(
            dimension_semantics=("parallel", "parallel"),
            vmem_limit_bytes=vmem_limit),
        cost_estimate=pl.CostEstimate(
            flops=int(30 * B * H * Wp),
            transcendentals=int(3 * B * H * Wp),
            bytes_accessed=int(12 * B * H * Wp)),
    )(gmin, xs_p, x_next)

    # Free (row-major bitcast) reshape interleaves the rows:
    # row 2r = original x row r, row 2r+1 = interpolated row r,
    # row 2H-1 = duplicated last input row (handled in-kernel).
    out = out.reshape(B, 2 * H, Wp)
    if Wp != W:
        out = out[:, :, :W]
    return out[:, None, :, :]


def _reference_forward(x):
    """Pure-JAX reference mirroring the PyTorch module (for verification)."""
    B, C, H, W = x.shape
    xs = x[:, 0].astype(jnp.float32)
    xp = jnp.pad(xs, ((0, 0), (0, 0), (1, 1)))
    win = jnp.stack(
        [xp[:, :-1, 0:W], xp[:, :-1, 1:W + 1], xp[:, :-1, 2:W + 2],
         xp[:, 1:, 0:W], xp[:, 1:, 1:W + 1], xp[:, 1:, 2:W + 2]], axis=-1)
    dk = jnp.array([SQRT2, 1.0, SQRT2, SQRT2, 1.0, SQRT2], jnp.float32)
    gmin = jnp.min(win)
    wi = (jnp.exp(-LAMBDA_WI * dk) * (2.0 / (1.0 + jnp.exp(win - gmin)))
          * (win != 0.0).astype(jnp.float32))
    num = (win * wi).sum(-1)
    den = wi.sum(-1)
    den = jnp.where(den == 0.0, 1.0, den)
    pixels = num / den
    H2 = 2 * H
    out = jnp.zeros((B, 1, H2, W), jnp.float32)
    out = out.at[:, 0, 0:H2:2, :].set(xs)
    out = out.at[:, 0, 1:H2 - 1:2, :].set(pixels)
    out = out.at[:, 0, H2 - 1, :].set(xs[:, -1, :])
    return out


if __name__ == "__main__":
    key = jax.random.PRNGKey(0)
    k1, k2, k3 = jax.random.split(key, 3)
    fwd = jax.jit(upsampling_conv_forward, static_argnames=("tile_h",))

    # Tolerance reflects the approximate EUP reciprocals (APPROX_RECIP=True);
    # set APPROX_RECIP=False for <1e-5 agreement with the exact reference.
    TOL = dict(rtol=2e-2, atol=2e-2)

    # Case 1: module defaults, W a multiple of 128; auto tiling picks TH=8 so
    # the grid has 4 steps (pipeline depth + work for both v7x TensorCores).
    x1 = jax.random.normal(k1, (2, 1, 16, 256), dtype=jnp.float32)
    out1 = jax.block_until_ready(fwd(x1))
    ref1 = jax.block_until_ready(_reference_forward(x1))
    assert out1.shape == (2, 1, 32, 256), out1.shape
    np.testing.assert_allclose(np.asarray(out1), np.asarray(ref1), **TOL)

    # Case 2: explicit H tiling (2 tiles): exercises the 1-row halo at the
    # tile seam and the duplicated-last-row override in the last tile.
    x2 = jax.random.normal(k2, (1, 1, 32, 128), dtype=jnp.float32)
    out2 = jax.block_until_ready(fwd(x2, tile_h=16))
    ref2 = jax.block_until_ready(_reference_forward(x2))
    assert out2.shape == (1, 1, 64, 128), out2.shape
    np.testing.assert_allclose(np.asarray(out2), np.asarray(ref2), **TOL)

    # Case 3: ragged H tiling (H % TH != 0) and W not a multiple of 128
    # (exercises the partial last block and the pad + slice fallback path).
    x3 = jax.random.normal(k3, (1, 1, 20, 200), dtype=jnp.float32)
    out3 = jax.block_until_ready(fwd(x3, tile_h=8))
    ref3 = jax.block_until_ready(_reference_forward(x3))
    assert out3.shape == (1, 1, 40, 200), out3.shape
    np.testing.assert_allclose(np.asarray(out3), np.asarray(ref3), **TOL)

    print("KERNEL_OK")
</pallas_src>

<mosaic_0001>
module attributes {stable_mosaic.version = 11 : i64} {
  func.func @_upsample_kernel(%arg0: i32, %arg1: i32, %arg2: memref<1x1xf32, #tpu.memory_space<smem>>, %arg3: memref<1x8x256xf32, #tpu.memory_space<vmem>>, %arg4: memref<1x1x1x256xf32, #tpu.memory_space<vmem>>, %arg5: memref<1x8x512xf32, #tpu.memory_space<vmem>>) attributes {dimension_semantics = [#tpu.dimension_semantics<parallel>, #tpu.dimension_semantics<parallel>], iteration_bounds = array<i64: 2, 2>, scalar_prefetch = 0 : i64, scratch_operands = 0 : i64, tpu.core_type = #tpu.core_type<tc>, window_params = [{transform_indices = @transform_0, window_bounds = array<i64: 1, 1>}, {transform_indices = @transform_1, window_bounds = array<i64: 1, 8, 256>}, {transform_indices = @transform_2, window_bounds = array<i64: 1, 1, 1, 256>}, {transform_indices = @transform_3, window_bounds = array<i64: 1, 8, 512>}]} {
    %c0 = arith.constant 0 : index
    %c0_0 = arith.constant 0 : index
    %0 = memref.load %arg2[%c0, %c0_0] : memref<1x1xf32, #tpu.memory_space<smem>>
    %c0_1 = arith.constant 0 : index
    %c0_2 = arith.constant 0 : index
    %c0_3 = arith.constant 0 : index
    %1 = vector.load %arg3[%c0_1, %c0_2, %c0_3] : memref<1x8x256xf32, #tpu.memory_space<vmem>>, vector<1x8x256xf32>
    %2 = vector.shape_cast %1 : vector<1x8x256xf32> to vector<8x256xf32>
    %c0_4 = arith.constant 0 : index
    %c0_5 = arith.constant 0 : index
    %c0_6 = arith.constant 0 : index
    %c0_7 = arith.constant 0 : index
    %3 = vector.load %arg4[%c0_4, %c0_5, %c0_6, %c0_7] : memref<1x1x1x256xf32, #tpu.memory_space<vmem>>, vector<1x1x1x256xf32>
    %4 = vector.shape_cast %3 : vector<1x1x1x256xf32> to vector<1x256xf32>
    %5 = tpu.concatenate %2, %4 in 0 : vector<8x256xf32>, vector<1x256xf32> -> vector<9x256xf32>
    %cst = arith.constant 0.000000e+00 : f32
    %6 = vector.broadcast %cst : f32 to vector<9x256xf32>
    %7 = arith.cmpf one, %5, %6 : vector<9x256xf32>
    %8 = arith.extui %7 : vector<9x256xi1> to vector<9x256xi32>
    %9 = arith.sitofp %8 : vector<9x256xi32> to vector<9x256xf32>
    %cst_8 = arith.constant 2.000000e+00 : f32
    %10 = vector.broadcast %cst_8 : f32 to vector<9x256xf32>
    %11 = arith.mulf %10, %9 : vector<9x256xf32>
    %12 = vector.broadcast %0 : f32 to vector<9x256xf32>
    %13 = arith.subf %5, %12 : vector<9x256xf32>
    %14 = math.exp %13 : vector<9x256xf32>
    %cst_9 = arith.constant 1.000000e+00 : f32
    %15 = vector.broadcast %cst_9 : f32 to vector<9x256xf32>
    %16 = arith.addf %15, %14 : vector<9x256xf32>
    %17 = tpu.reciprocal %16 {approx = true} : vector<9x256xf32> -> vector<9x256xf32>
    %18 = arith.mulf %11, %17 : vector<9x256xf32>
    %19 = arith.mulf %5, %18 : vector<9x256xf32>
    %20 = vector.extract_strided_slice %19 {offsets = [0, 0], sizes = [8, 256], strides = [1, 1]} : vector<9x256xf32> to vector<8x256xf32>
    %21 = vector.extract_strided_slice %19 {offsets = [1, 0], sizes = [8, 256], strides = [1, 1]} : vector<9x256xf32> to vector<8x256xf32>
    %22 = arith.addf %20, %21 : vector<8x256xf32>
    %23 = vector.extract_strided_slice %18 {offsets = [0, 0], sizes = [8, 256], strides = [1, 1]} : vector<9x256xf32> to vector<8x256xf32>
    %24 = vector.extract_strided_slice %18 {offsets = [1, 0], sizes = [8, 256], strides = [1, 1]} : vector<9x256xf32> to vector<8x256xf32>
    %25 = arith.addf %23, %24 : vector<8x256xf32>
    %26 = tpu.iota {dimensions = array<i32: 1>} : vector<8x256xi32>
    %c0_i32 = arith.constant 0 : i32
    %27 = vector.broadcast %c0_i32 : i32 to vector<8x256xi32>
    %28 = arith.cmpi eq, %26, %27 : vector<8x256xi32>
    %c255_i32 = arith.constant 255 : i32
    %29 = vector.broadcast %c255_i32 : i32 to vector<8x256xi32>
    %30 = arith.cmpi eq, %26, %29 : vector<8x256xi32>
    %c1_i32 = arith.constant 1 : i32
    %31 = tpu.dynamic_rotate %22 by %c1_i32 dim 1 : vector<8x256xf32>, i32 -> vector<8x256xf32>
    %cst_10 = arith.constant 0.000000e+00 : f32
    %32 = vector.broadcast %cst_10 : f32 to vector<8x256xf32>
    %33 = arith.select %28, %32, %31 : vector<8x256xi1>, vector<8x256xf32>
    %c255_i32_11 = arith.constant 255 : i32
    %34 = tpu.dynamic_rotate %22 by %c255_i32_11 dim 1 : vector<8x256xf32>, i32 -> vector<8x256xf32>
    %cst_12 = arith.constant 0.000000e+00 : f32
    %35 = vector.broadcast %cst_12 : f32 to vector<8x256xf32>
    %36 = arith.select %30, %35, %34 : vector<8x256xi1>, vector<8x256xf32>
    %cst_13 = arith.constant 0.606530666 : f32
    %37 = vector.broadcast %cst_13 : f32 to vector<8x256xf32>
    %38 = arith.mulf %37, %22 : vector<8x256xf32>
    %39 = arith.addf %33, %36 : vector<8x256xf32>
    %cst_14 = arith.constant 0.493068695 : f32
    %40 = vector.broadcast %cst_14 : f32 to vector<8x256xf32>
    %41 = arith.mulf %40, %39 : vector<8x256xf32>
    %42 = arith.addf %38, %41 : vector<8x256xf32>
    %c1_i32_15 = arith.constant 1 : i32
    %43 = tpu.dynamic_rotate %25 by %c1_i32_15 dim 1 : vector<8x256xf32>, i32 -> vector<8x256xf32>
    %cst_16 = arith.constant 0.000000e+00 : f32
    %44 = vector.broadcast %cst_16 : f32 to vector<8x256xf32>
    %45 = arith.select %28, %44, %43 : vector<8x256xi1>, vector<8x256xf32>
    %c255_i32_17 = arith.constant 255 : i32
    %46 = tpu.dynamic_rotate %25 by %c255_i32_17 dim 1 : vector<8x256xf32>, i32 -> vector<8x256xf32>
    %cst_18 = arith.constant 0.000000e+00 : f32
    %47 = vector.broadcast %cst_18 : f32 to vector<8x256xf32>
    %48 = arith.select %30, %47, %46 : vector<8x256xi1>, vector<8x256xf32>
    %cst_19 = arith.constant 0.606530666 : f32
    %49 = vector.broadcast %cst_19 : f32 to vector<8x256xf32>
    %50 = arith.mulf %49, %25 : vector<8x256xf32>
    %51 = arith.addf %45, %48 : vector<8x256xf32>
    %cst_20 = arith.constant 0.493068695 : f32
    %52 = vector.broadcast %cst_20 : f32 to vector<8x256xf32>
    %53 = arith.mulf %52, %51 : vector<8x256xf32>
    %54 = arith.addf %50, %53 : vector<8x256xf32>
    %cst_21 = arith.constant 0.000000e+00 : f32
    %55 = vector.broadcast %cst_21 : f32 to vector<8x256xf32>
    %56 = arith.cmpf oeq, %54, %55 : vector<8x256xf32>
    %cst_22 = arith.constant 1.000000e+00 : f32
    %57 = vector.broadcast %cst_22 : f32 to vector<8x256xf32>
    %58 = arith.select %56, %57, %54 : vector<8x256xi1>, vector<8x256xf32>
    %59 = tpu.reciprocal %58 {approx = true} : vector<8x256xf32> -> vector<8x256xf32>
    %60 = arith.mulf %42, %59 : vector<8x256xf32>
    %c8_i32 = arith.constant 8 : i32
    %61 = arith.muli %arg1, %c8_i32 : i32
    %62 = tpu.iota {dimensions = array<i32: 0>} : vector<8x1xi32>
    %63 = vector.broadcast %61 : i32 to vector<8x1xi32>
    %64 = arith.addi %63, %62 : vector<8x1xi32>
    %c15_i32 = arith.constant 15 : i32
    %65 = vector.broadcast %c15_i32 : i32 to vector<8x1xi32>
    %66 = arith.cmpi eq, %64, %65 : vector<8x1xi32>
    %67 = vector.shape_cast %66 : vector<8x1xi1> to vector<8x1xi1>
    %68 = vector.broadcast %67 : vector<8x1xi1> to vector<8x256xi1>
    %69 = arith.select %68, %2, %60 : vector<8x256xi1>, vector<8x256xf32>
    %c0_23 = arith.constant 0 : index
    %c0_24 = arith.constant 0 : index
    %c0_25 = arith.constant 0 : index
    %70 = vector.load %arg5[%c0_23, %c0_24, %c0_25] : memref<1x8x512xf32, #tpu.memory_space<vmem>>, vector<1x8x256xf32>
    %71 = vector.shape_cast %70 : vector<1x8x256xf32> to vector<8x256xf32>
    %72 = vector.shape_cast %2 : vector<8x256xf32> to vector<1x8x256xf32>
    tpu.vector_store %arg5[%c0_23, %c0_24, %c0_25], %72 {strides = array<i32>} : memref<1x8x512xf32, #tpu.memory_space<vmem>>, vector<1x8x256xf32>,
    %c0_26 = arith.constant 0 : index
    %c0_27 = arith.constant 0 : index
    %c256 = arith.constant 256 : index
    %73 = vector.load %arg5[%c0_26, %c0_27, %c256] : memref<1x8x512xf32, #tpu.memory_space<vmem>>, vector<1x8x256xf32>
    %74 = vector.shape_cast %73 : vector<1x8x256xf32> to vector<8x256xf32>
    %75 = vector.shape_cast %69 : vector<8x256xf32> to vector<1x8x256xf32>
    tpu.vector_store %arg5[%c0_26, %c0_27, %c256], %75 {strides = array<i32>} : memref<1x8x512xf32, #tpu.memory_space<vmem>>, vector<1x8x256xf32>,
    return
  }
  func.func @transform_0(%arg0: i32, %arg1: i32) -> (i32, i32) {
    %c0_i32 = arith.constant 0 : i32
    %c0_i32_0 = arith.constant 0 : i32
    %c0_i32_1 = arith.constant 0 : i32
    return %c0_i32, %c0_i32_0 : i32, i32
  }
  func.func @transform_1(%arg0: i32, %arg1: i32) -> (i32, i32, i32) {
    %c0_i32 = arith.constant 0 : i32
    %c0_i32_0 = arith.constant 0 : i32
    return %arg0, %arg1, %c0_i32 : i32, i32, i32
  }
  func.func @transform_2(%arg0: i32, %arg1: i32) -> (i32, i32, i32, i32) {
    %c0_i32 = arith.constant 0 : i32
    %c0_i32_0 = arith.constant 0 : i32
    %c0_i32_1 = arith.constant 0 : i32
    return %arg0, %arg1, %c0_i32, %c0_i32_0 : i32, i32, i32, i32
  }
  func.func @transform_3(%arg0: i32, %arg1: i32) -> (i32, i32, i32) {
    %c0_i32 = arith.constant 0 : i32
    %c0_i32_0 = arith.constant 0 : i32
    return %arg0, %arg1, %c0_i32 : i32, i32, i32
  }
}

</mosaic_0001>

<bundles_post_ra>
// kernel: upsampling_conv_forward.1
= control target key start
LH: loop header
LB: loop body
LE: loop exit
PB: predicated region body
PF: predicated region fallthrough
CT: control target
= control target key end

     0   :  { %s669_s14 = smov 0   ;;  %s671_s15 = smov 0   ;;  %s779_s0 = inlined_call_operand.<no memory space> [shape: f32[1,1], index: 0, kind: input, shape index: {}]   ;;  %s780_s1 = inlined_call_operand.vmem [shape: f32[2,16,256], index: 1, kind: input, shape index: {}]   ;;  %s781_s2 = inlined_call_operand.vmem [shape: f32[2,2,1,256], index: 2, kind: input, shape index: {}]   ;;  %s782_s3 = inlined_call_operand.vmem [shape: f32[2,16,512], index: 3, kind: output, shape index: {}]  }
   0x1   :  { %8 = sst [smem:[#allocation2]] %s779_s0  ;;  %s673_s16 = smov 0  }
   0x2   :  { %s675_s17 = smov 0   ;;  %s677_s18 = smov 0  }
   0x3 LB: > { %s23_s0 = sadd.s32 1, %s633_s16  ;;  %s26_s19 = sadd.s32 1, %s637_s17  ;;  %s641_s18 = sphi %s677_s18, %s14_s18   ;;  %s637_s17 = sphi %s675_s17, %s786_s17   ;;  %s633_s16 = sphi %s673_s16, %s785_s16   ;;  %s629_s15 = sphi %s671_s15, %s784_s15   ;;  %s625_s14 = sphi %s669_s14, %s783_s14  }
   0x4   : > { %p24_p0 = scmp.ge.s32.totalorder %s23_s0, 2  ;;  %p524_p1 = scmp.ge.s32.totalorder %s641_s18, 1 }
   0x5   : > { %p173_p2 = scmp.lt.s32.totalorder %s641_s18, 5 }
   0x6   : > { %s788_s0 = smov (%p24_p0, %s23_s0), 0  ;;  %s790_s19 = smov (!%p24_p0, %s26_s19), %s637_s17 }
   0x7   : > { %p174_p3 = pnand %p524_p1, %p173_p2  ;;  %p28_p4 = scmp.ge.s32.totalorder %s790_s19, 2 }
   0x8   : > { %p213_p5 = scmp.lt.s32.totalorder (!%p174_p3), %s629_s15, 1  ;;  %p215_p6 = scmp.lt.s32.totalorder (!%p174_p3), %s625_s14, 1  ;;  %v244_v0 = vlaneseq (!%p174_p3)  ;;  %v643_v26 = vmov (!%p174_p3), 0.0   ;;  %vm303_vm4 = vcmask (!%p174_p3), 1046528  }
   0x9   : > { %s792_s19 = smov (%p28_p4, %s790_s19), 0  ;;  %177 = sbr.rel (%p174_p3) target bundleno = 205 (0xcd), region = 32 }
   0xa   : > { %s239_s20 = sld [smem:[#allocation2]] (!%p174_p3)  ;;  %v705_v1 = vshrl.u32 (!%p174_p3), %v244_v0, 7  ;;  %s644_s5 = smov (!%p174_p3), 127   ;;  %v329_v63 = vand.u32 (!%p174_p3), 127, %v244_v0 }
   0xb   : > { %s645_s6 = smov (!%p174_p3), 1  }
   0xc   : > { %v246_v2 = vsub.s32 (!%p174_p3), 0, %v705_v1  ;;  %v250_v3 = vsub.s32 (!%p174_p3), 1, %v705_v1  ;;  %vm348_vm5 = vcmp.lt.s32.totalorder (!%p174_p3), %v329_v63, 127  ;;  %vm339_vm6 = vcmp.lt.s32.totalorder (!%p174_p3), %v329_v63, 1 }
   0xd   : > { %vm331_vm8 = vcmp.eq.s32.totalorder (!%p174_p3), %v329_v63, 0 }
  0x10   : > { %s794_s15 = smov (!%p213_p5, %s629_s15), 1  ;;  %v270_v4 = vstv %s239_s20 }
  0x11   : > { %s708_s21 = scalar_select %p215_p6, %s625_s14, 1 }
  0x12   : > { %s526_s22 = sshll.u32 %s794_s15, 2  ;;  %s531_s8 = sshll.u32 %s794_s15, 3 }
  0x13   : > { %s525_s23 = sshll.u32 %s708_s21, 1  ;;  %s530_s7 = sshll.u32 %s708_s21, 2 }
  0x14   : > { %s219_s24 = sadd.s32 %s526_s22, %s525_s23  ;;  %s236_s9 = sadd.s32 %s531_s8, %s530_s7 }
  0x15   : > { %s527_s25 = sshll.u32 %s219_s24, 3  ;;  %s229_s28 = scalar_lea.vmem %s781_s2, %s219_s24 }
  0x16   : > { %s221_s4 = scalar_lea.vmem %s780_s1, %s527_s25  ;;  %v242_v5 = vld [vmem:[%s229_s28] sm:$0x3]  ;;  %s532_s10 = sshll.u32 %s236_s9, 3 }
  0x17   : > { %v720_v6 = vld [vmem:[%s221_s4] sm:$0xff]  ;;  %v247_v7 = vrot.slane %v242_v5, %v246_v2  ;;  %v722_v8 = vld [vmem:[%s221_s4 + $0x8] sm:$0xff]  ;;  %v251_v10 = vrot.slane %v242_v5, %v250_v3  ;;  %s739_s13 = scalar_lea.vmem %s782_s3, %s532_s10  ;;  %v330_v2 = vadd.s32 128, %v329_v63  ;;  %s537_s15 = sshll.u32 %s625_s14, 3 }
  0x18   : > { %v271_v9 = vsub.f32 %v720_v6, %v270_v4  ;;  %v272_v11 = vsub.f32 %v722_v8, %v270_v4  ;;  %vm254_vm0 = vcmp.ne.f32.partialorder %v720_v6, 0.0  ;;  %vm255_vm2 = vcmp.ne.f32.partialorder %v722_v8, 0.0  ;;  %403 = vst [vmem:[%s739_s13] sm:$0xff] %v720_v6  ;;  %404 = vst [vmem:[%s739_s13 + $0x8] sm:$0xff] %v722_v8 }
  0x19   : > { %v273_v12 = vsub.f32 %v247_v7, %v270_v4  ;;  %v274_v15 = vsub.f32 %v251_v10, %v270_v4  ;;  %vm256_vm1 = vcmp.ne.f32.partialorder %v247_v7, 0.0  ;;  %v533_v27 = vsel %vm254_vm0, 1.0, %v643_v26 }
  0x1a   : > { %v275_v13 = vmul.f32 1.442695, %v271_v9  ;;  %v277_v16 = vmul.f32 1.442695, %v272_v11  ;;  %v535_v28 = vsel %vm256_vm1, 1.0, %v643_v26  ;;  %vm257_vm3 = vcmp.ne.f32.partialorder %v251_v10, 0.0 }
  0x1b   : > { %v279_v14 = vmul.f32 1.442695, %v273_v12  ;;  %v281_v17 = vmul.f32 1.442695, %v274_v15  ;;  %v534_v29 = vsel %vm255_vm2, 1.0, %v643_v26  ;;  %v266_v30 = vmul.f32 2.0, %v533_v27 }
  0x1c   : > { %583 = vpow2.f32 %v275_v13  ;;  %v268_v31 = vmul.f32 2.0, %v535_v28  ;;  %v536_v32 = vsel %vm257_vm3, 1.0, %v643_v26  ;;  %v267_v33 = vmul.f32 2.0, %v534_v29 }
  0x1d   : > { %585 = vpow2.f32 %v279_v14  ;;  %v269_v37 = vmul.f32 2.0, %v536_v32  ;;  %vm334_vm7 = vcmp.eq.s32.totalorder %v330_v2, 255 }
  0x1e   : > { %587 = vpow2.f32 %v277_v16 }
  0x1f   : > { %589 = vpow2.f32 %v281_v17 }
  0x26   : > { %v584_v18 = vpop.eup %583 }
  0x27   : > { %v586_v19 = vpop.eup %585  ;;  %v283_v20 = vadd.f32 1.0, %v584_v18 }
  0x28   : > { %v588_v21 = vpop.eup %587  ;;  %v285_v22 = vadd.f32 1.0, %v586_v19 }
  0x29   : > { %591 = vrcp.f32 %v283_v20  ;;  %v284_v23 = vadd.f32 1.0, %v588_v21  ;;  %v590_v24 = vpop.eup %589 }
  0x2a   : > { %593 = vrcp.f32 %v285_v22  ;;  %v286_v25 = vadd.f32 1.0, %v590_v24 }
  0x2b   : > { %595 = vrcp.f32 %v284_v23 }
  0x2c   : > { %597 = vrcp.f32 %v286_v25 }
  0x33   : > { %v592_v34 = vpop.eup %591 }
  0x34   : > { %v594_v35 = vpop.eup %593  ;;  %v291_v36 = vmul.f32 %v592_v34, %v266_v30 }
  0x35   : > { %v596_v38 = vpop.eup %595  ;;  %v293_v39 = vmul.f32 %v594_v35, %v268_v31 }
  0x36   : > { %v318_v40 = vrot.slane %v291_v36, 1  ;;  %v292_v41 = vmul.f32 %v596_v38, %v267_v33  ;;  %v295_v42 = vmul.f32 %v291_v36, %v720_v6  ;;  %v598_v43 = vpop.eup %597 }
  0x37   : > { %v319_v44 = vrot.slane %v293_v39, 1  ;;  %v297_v45 = vmul.f32 %v293_v39, %v247_v7  ;;  %v294_v46 = vmul.f32 %v598_v43, %v269_v37 }
  0x38   : > { %v321_v47 = vrot.slane %v292_v41, 1  ;;  %v296_v48 = vmul.f32 %v292_v41, %v722_v8  ;;  %v304_v50 = vrot.slane %v295_v42, 1 }
  0x39   : > { %v320_v49 = vsel %vm303_vm4, %v318_v40, %v319_v44  ;;  %v305_v51 = vrot.slane %v297_v45, 1  ;;  %v322_v53 = vrot.slane %v294_v46, 1  ;;  %v298_v54 = vmul.f32 %v294_v46, %v251_v10 }
  0x3a   : > { %v326_v52 = vadd.f32 %v320_v49, %v291_v36  ;;  %v307_v55 = vrot.slane %v296_v48, 1  ;;  %v396_v40 = vstv %s537_s15 }
  0x3b   : > { %v323_v56 = vsel %vm303_vm4, %v321_v47, %v322_v53  ;;  %v308_v57 = vrot.slane %v298_v54, 1  ;;  %v306_v59 = vsel %vm303_vm4, %v304_v50, %v305_v51  ;;  %v397_v43 = vadd.s32 %v396_v40, %v705_v1 }
  0x3c   : > { %369 = vrot.lane.b32.xlu1 %v326_v52, %s644_s5  ;;  %361 = vrot.lane.b32.xlu0 %v326_v52, %s645_s6  ;;  %v327_v58 = vadd.f32 %v323_v56, %v292_v41  ;;  %v312_v62 = vadd.f32 %v306_v59, %v295_v42  ;;  %v377_v15 = vmul.f32 0.60653067, %v326_v52 }
  0x3d   : > { %v309_v60 = vsel %vm303_vm4, %v307_v55, %v308_v57  ;;  %vm398_vm11 = vcmp.eq.s32.totalorder %v397_v43, 15 }
  0x3e   : > { %v313_v61 = vadd.f32 %v309_v60, %v296_v48  ;;  %v378_v14 = vmul.f32 0.60653067, %v327_v58  ;;  %v353_v29 = vmul.f32 0.60653067, %v312_v62 }
  0x40   : > { %371 = vrot.lane.b32.xlu1 %v327_v58, %s644_s5  ;;  %363 = vrot.lane.b32.xlu0 %v327_v58, %s645_s6  ;;  %v354_v36 = vmul.f32 0.60653067, %v313_v61 }
  0x44   : > { %337 = vrot.lane.b32.xlu1 %v313_v61, %s645_s6  ;;  %335 = vrot.lane.b32.xlu0 %v312_v62, %s645_s6 }
  0x48   : > { %346 = vrot.lane.b32.xlu1 %v313_v61, %s644_s5  ;;  %344 = vrot.lane.b32.xlu0 %v312_v62, %s644_s5 }
  0xae   : > { %v370_v3 = vpop.permute.xlu1 %369  ;;  %v362_v4 = vpop.permute.xlu0 %361 }
  0xb2   : > { %v372_v5 = vpop.permute.xlu1 %371  ;;  %v364_v7 = vpop.permute.xlu0 %363 }
  0xb3   : > { %v373_v9 = vsel %vm348_vm5, %v370_v3, %v372_v5  ;;  %v374_v10 = vsel %vm348_vm5, %v372_v5, %v370_v3  ;;  %v365_v11 = vsel %vm339_vm6, %v362_v4, %v364_v7  ;;  %v366_v12 = vsel %vm339_vm6, %v364_v7, %v362_v4 }
  0xb4   : > { %v376_v13 = vsel %vm334_vm7, 0.0, %v374_v10  ;;  %v367_v0 = vsel %vm331_vm8, 0.0, %v366_v12 }
  0xb5   : > { %v379_v16 = vadd.f32 %v373_v9, %v367_v0  ;;  %v380_v17 = vadd.f32 %v376_v13, %v365_v11 }
  0xb6   : > { %v338_v18 = vpop.permute.xlu1 %337  ;;  %v336_v19 = vpop.permute.xlu0 %335 }
  0xb7   : > { %v381_v20 = vmul.f32 0.4930687, %v379_v16  ;;  %v382_v21 = vmul.f32 0.4930687, %v380_v17  ;;  %v341_v22 = vsel %vm339_vm6, %v338_v18, %v336_v19  ;;  %v340_v26 = vsel %vm339_vm6, %v336_v19, %v338_v18 }
  0xb8   : > { %v342_v25 = vsel %vm331_vm8, 0.0, %v341_v22 }
  0xb9   : > { %v383_v23 = vadd.f32 %v381_v20, %v377_v15  ;;  %v384_v24 = vadd.f32 %v382_v21, %v378_v14 }
  0xba   : > { %v347_v27 = vpop.permute.xlu1 %346  ;;  %v345_v28 = vpop.permute.xlu0 %344 }
  0xbb   : > { %vm385_vm9 = vcmp.eq.f32.partialorder %v383_v23, 0.0  ;;  %vm386_vm10 = vcmp.eq.f32.partialorder %v384_v24, 0.0  ;;  %v349_v30 = vsel %vm348_vm5, %v345_v28, %v347_v27  ;;  %v350_v31 = vsel %vm348_vm5, %v347_v27, %v345_v28 }
  0xbc   : > { %v387_v32 = vsel %vm385_vm9, 1.0, %v383_v23  ;;  %v388_v33 = vsel %vm386_vm10, 1.0, %v384_v24  ;;  %v352_v34 = vsel %vm334_vm7, 0.0, %v350_v31  ;;  %v355_v35 = vadd.f32 %v349_v30, %v342_v25 }
  0xbd   : > { %599 = vrcp.f32 %v387_v32  ;;  %v356_v37 = vadd.f32 %v352_v34, %v340_v26 }
  0xbe   : > { %601 = vrcp.f32 %v388_v33  ;;  %v357_v38 = vmul.f32 0.4930687, %v355_v35 }
  0xbf   : > { %v358_v39 = vmul.f32 0.4930687, %v356_v37 }
  0xc0   : > { %v359_v41 = vadd.f32 %v357_v38, %v353_v29 }
  0xc1   : > { %v360_v42 = vadd.f32 %v358_v39, %v354_v36 }
  0xc7   : > { %v600_v44 = vpop.eup %599 }
  0xc8   : > { %v602_v45 = vpop.eup %601  ;;  %v391_v46 = vmul.f32 %v600_v44, %v359_v41 }
  0xc9   : > { %v392_v47 = vmul.f32 %v602_v45, %v360_v42 }
  0xca   : > { %v401_v48 = vsel %vm398_vm11, %v720_v6, %v391_v46 }
  0xcb   : > { %v402_v49 = vsel %vm398_vm11, %v722_v8, %v392_v47  ;;  %405 = vst [vmem:[%s739_s13 + $0x10] sm:$0xff] %v401_v48 }
  0xcc   : > { %406 = vst [vmem:[%s739_s13 + $0x18] sm:$0xff] %v402_v49 }
  0xcd PF: > { %s14_s18 = sadd.s32 1, %s641_s18   ;;  %s783_s14 = smov %s633_s16 }
  0xce   : > { %p11_p7 = scmp.ge.s32.totalorder %s14_s18, 6   ;;  %s784_s15 = smov %s637_s17 }
  0xcf   : > { %s785_s16 = smov %s788_s0  ;;  %s786_s17 = smov %s792_s19 }
  0xd0   :  { %13 = sbr.rel (!%p11_p7) target bundleno = 3 (0x3), region = 65 }

</bundles_post_ra>
